<compile_context>
chip_gen: v7x
topology: tpu7x:2x2x1
jax: 0.10.0
libtpu: 0.0.40
codegen_flags: <defaults>
</compile_context>

<pallas_src>
from functools import partial

import jax
import jax.numpy as jnp
from jax.experimental import pallas as pl
from jax.experimental.pallas import tpu as pltpu


_OUT_PAD = 8                       # padded width of the 2-wide output projection
_VMEM_CAP = 48 * 1024 * 1024       # leave headroom on v7x's 64 MiB per-TC VMEM
_HAS_BUFFERED = hasattr(pl, "Buffered")   # decided once at import


def _round_up(x, m):
    return ((x + m - 1) // m) * m


def _spatial_rel_kernel(x_ref, w1_ref, b1_ref, g_ref, beta_ref, w2_ref, b2_ref, o_ref):
    # ---- Linear(2H -> H) on the MXU: bf16 operands, f32 accumulation ----
    x_bf = x_ref[...].astype(jnp.bfloat16)   # in-kernel cast (VPU); no HBM pre-pass
    h = jnp.dot(x_bf, w1_ref[...], preferred_element_type=jnp.float32)
    h = h + b1_ref[...]

    # ---- ReLU ----
    h = jnp.maximum(h, 0.0)

    # ---- BertLayerNorm(H, eps=1e-12): two-pass f32 statistics (no cancellation) ----
    mu = jnp.mean(h, axis=-1, keepdims=True)
    c = h - mu
    var = jnp.mean(c * c, axis=-1, keepdims=True)
    hn = c * jax.lax.rsqrt(var + 1e-12)
    hn = hn * g_ref[...] + beta_ref[...]

    # ---- Dropout: identity in eval mode ----

    # ---- Linear(H -> 2), padded to 8 output lanes ----
    out = jnp.dot(hn.astype(w2_ref.dtype), w2_ref[...],
                  preferred_element_type=jnp.float32)
    o_ref[...] = (out + b2_ref[...]).astype(o_ref.dtype)


def _choose_tile_n(N, tile_n):
    # At most ceil(N/2) rows per tile so grid >= 2 whenever N allows it (lets the
    # "parallel" axis shard across both v7x TensorCores); multiple of 16 for
    # bf16 sublane packing, and multiple of 256 (MXU M) for large tiles.
    half = _round_up(max((N + 1) // 2, 1), 16)
    t = min(_round_up(tile_n, 16), half)
    if t >= 256:
        t = (t // 256) * 256
    return max(t, 16)


def _vmem_budget_bytes(tile_n, two_h, hidden):
    f32, bf16 = 4, 2
    budget = (
        2 * tile_n * two_h * f32                     # x tile (f32), double-buffered
        + two_h * hidden * bf16                      # w1 (single-buffered)
        + 3 * hidden * f32                           # b1 / gamma / beta
        + hidden * _OUT_PAD * bf16 + _OUT_PAD * f32  # w2 / b2
        + 2 * tile_n * _OUT_PAD * f32                # out tile, double-buffered
        + 2 * tile_n * hidden * f32                  # h / hn temporaries
    )
    return 2 * budget  # headroom for Mosaic internal scratch


def _build(N, two_h, hidden, tile_n_eff, vmem_limit):
    grid = (pl.cdiv(N, tile_n_eff),)

    def const_spec(shape):
        # Constant index_map -> fetched once; single-buffer it so resident
        # weights do not double their VMEM footprint.
        if _HAS_BUFFERED:
            return pl.BlockSpec(shape, lambda i: (0, 0),
                                pipeline_mode=pl.Buffered(1))
        return pl.BlockSpec(shape, lambda i: (0, 0))

    grid_spec = pl.GridSpec(
        grid=grid,
        in_specs=[
            pl.BlockSpec((tile_n_eff, two_h), lambda i: (i, 0)),  # x tile (f32)
            const_spec((two_h, hidden)),     # w1 (bf16)
            const_spec((1, hidden)),         # b1
            const_spec((1, hidden)),         # gamma
            const_spec((1, hidden)),         # beta
            const_spec((hidden, _OUT_PAD)),  # w2 (padded to 8 lanes, bf16)
            const_spec((1, _OUT_PAD)),       # b2 (padded)
        ],
        out_specs=pl.BlockSpec((tile_n_eff, _OUT_PAD), lambda i: (i, 0)),
    )
    return pl.pallas_call(
        _spatial_rel_kernel,
        out_shape=jax.ShapeDtypeStruct((N, _OUT_PAD), jnp.float32),
        grid_spec=grid_spec,
        compiler_params=pltpu.CompilerParams(
            dimension_semantics=("parallel",),
            vmem_limit_bytes=vmem_limit,
        ),
    )


def prepare_params(params):
    """One-time weight preprocessing (hoisted out of the per-call path)."""
    w1, b1, gamma, beta, w2, b2 = params
    H = w1.shape[1]
    w1_bf = jnp.asarray(w1, jnp.bfloat16)
    b1_2d = jnp.asarray(b1, jnp.float32).reshape(1, H)
    gamma_2d = jnp.asarray(gamma, jnp.float32).reshape(1, H)
    beta_2d = jnp.asarray(beta, jnp.float32).reshape(1, H)
    w2_pad = jnp.zeros((H, _OUT_PAD), jnp.bfloat16).at[:, :2].set(
        jnp.asarray(w2, jnp.bfloat16))
    b2_pad = jnp.zeros((1, _OUT_PAD), jnp.float32).at[:, :2].set(
        jnp.asarray(b2, jnp.float32).reshape(1, 2))
    return (w1_bf, b1_2d, gamma_2d, beta_2d, w2_pad, b2_pad)


@partial(jax.jit, static_argnames=("tile_n",))
def spatial_rel_regression(x, prepared_params, *, tile_n=1024):
    """x: (N, 2*H) float32, prepared_params from prepare_params(). Returns (N, 2) f32."""
    N, two_h = x.shape
    w1_bf, b1_2d, gamma_2d, beta_2d, w2_pad, b2_pad = prepared_params
    H = w1_bf.shape[1]
    assert two_h == 2 * H, (two_h, H)

    tile_n_eff = _choose_tile_n(N, tile_n)
    while _vmem_budget_bytes(tile_n_eff, two_h, H) > _VMEM_CAP and tile_n_eff > 16:
        tile_n_eff = max(16, tile_n_eff // 2)
    budget = _vmem_budget_bytes(tile_n_eff, two_h, H)
    if budget > _VMEM_CAP:
        raise ValueError(
            f"hidden={H} too large for resident-weight scheme "
            f"(needs ~{budget >> 20} MiB VMEM > {_VMEM_CAP >> 20} MiB); "
            "a K-tiled accumulator path is required.")
    vmem_limit = int(min(max(budget, 16 * 1024 * 1024), _VMEM_CAP))

    out_pad = _build(N, two_h, H, tile_n_eff, vmem_limit)(
        x.astype(jnp.float32), w1_bf, b1_2d, gamma_2d, beta_2d, w2_pad, b2_pad)
    return out_pad[:, :2]


def init_params(key, hidden_size):
    """Deterministic synthetic init mirroring the PyTorch module's shapes.

    nn.Linear(2H, H): weight (H, 2H), bias (H,)  -> stored transposed (2H, H)
    BertLayerNorm(H): gamma (H,) ones, beta (H,) zeros
    nn.Linear(H, 2):  weight (2, H), bias (2,)   -> stored transposed (H, 2)
    """
    k1, k2, k3, k4 = jax.random.split(key, 4)
    H = hidden_size
    w1 = jax.random.normal(k1, (2 * H, H), jnp.float32) * 0.02
    b1 = jax.random.normal(k2, (1, H), jnp.float32) * 0.02
    gamma = jnp.ones((1, H), jnp.float32)
    beta = jnp.zeros((1, H), jnp.float32)
    w2 = jax.random.normal(k3, (H, 2), jnp.float32) * 0.02
    b2 = jax.random.normal(k4, (1, 2), jnp.float32) * 0.02
    return (w1, b1, gamma, beta, w2, b2)


def reference_jax(x, params):
    """Pure-JAX f32 reference for correctness checking."""
    w1, b1, gamma, beta, w2, b2 = params
    h = x @ w1 + b1
    h = jnp.maximum(h, 0.0)
    mu = jnp.mean(h, axis=-1, keepdims=True)
    var = jnp.mean((h - mu) ** 2, axis=-1, keepdims=True)
    hn = (h - mu) / jnp.sqrt(var + 1e-12)
    hn = hn * gamma + beta
    return hn @ w2 + b2


if __name__ == "__main__":
    hidden_size = 32          # H
    batch, seq = 2, 8         # flattened into N = 16 rows of 2*H features
    N = batch * seq

    key = jax.random.PRNGKey(0)
    kx, kp = jax.random.split(key)
    x = jax.random.normal(kx, (N, 2 * hidden_size), jnp.float32)
    params = init_params(kp, hidden_size)
    prepared = prepare_params(params)   # one-time weight preprocessing

    out = spatial_rel_regression(x, prepared)
    out = jax.block_until_ready(out)

    ref = reference_jax(x, params)
    assert out.shape == (N, 2), out.shape
    # bf16 MXU operands (f32 accumulation) -> allow ~1e-2 deviation vs f32 ref.
    assert jnp.allclose(out, ref, atol=2e-2, rtol=2e-2), "mismatch vs reference"

    print("KERNEL_OK")
</pallas_src>

<mosaic_0001>
module attributes {stable_mosaic.version = 11 : i64} {
  func.func @_spatial_rel_kernel(%arg0: i32, %arg1: memref<16x64xf32, #tpu.memory_space<vmem>>, %arg2: memref<64x32xbf16, #tpu.memory_space<vmem>>, %arg3: memref<1x32xf32, #tpu.memory_space<vmem>>, %arg4: memref<1x32xf32, #tpu.memory_space<vmem>>, %arg5: memref<1x32xf32, #tpu.memory_space<vmem>>, %arg6: memref<32x8xbf16, #tpu.memory_space<vmem>>, %arg7: memref<1x8xf32, #tpu.memory_space<vmem>>, %arg8: memref<16x8xf32, #tpu.memory_space<vmem>>) attributes {dimension_semantics = [#tpu.dimension_semantics<parallel>], iteration_bounds = array<i64: 1>, scalar_prefetch = 0 : i64, scratch_operands = 0 : i64, tpu.core_type = #tpu.core_type<tc>, window_params = [{transform_indices = @transform_0, window_bounds = array<i64: 16, 64>}, {pipeline_mode = #tpu.pipeline_mode<synchronous>, transform_indices = @transform_1, window_bounds = array<i64: 64, 32>}, {pipeline_mode = #tpu.pipeline_mode<synchronous>, transform_indices = @transform_2, window_bounds = array<i64: 1, 32>}, {pipeline_mode = #tpu.pipeline_mode<synchronous>, transform_indices = @transform_3, window_bounds = array<i64: 1, 32>}, {pipeline_mode = #tpu.pipeline_mode<synchronous>, transform_indices = @transform_4, window_bounds = array<i64: 1, 32>}, {pipeline_mode = #tpu.pipeline_mode<synchronous>, transform_indices = @transform_5, window_bounds = array<i64: 32, 8>}, {pipeline_mode = #tpu.pipeline_mode<synchronous>, transform_indices = @transform_6, window_bounds = array<i64: 1, 8>}, {transform_indices = @transform_7, window_bounds = array<i64: 16, 8>}]} {
    %c0 = arith.constant 0 : index
    %c0_0 = arith.constant 0 : index
    %0 = vector.load %arg1[%c0, %c0_0] : memref<16x64xf32, #tpu.memory_space<vmem>>, vector<16x64xf32>
    %1 = arith.truncf %0 : vector<16x64xf32> to vector<16x64xbf16>
    %c0_1 = arith.constant 0 : index
    %c0_2 = arith.constant 0 : index
    %2 = vector.load %arg2[%c0_1, %c0_2] : memref<64x32xbf16, #tpu.memory_space<vmem>>, vector<64x32xbf16>
    %cst = arith.constant dense<0.000000e+00> : vector<16x32xf32>
    %3 = tpu.matmul %1, %2, %cst {dimension_numbers = #tpu.dot_dimension_numbers<[1], [0], [0], [1], [0, 0, 1, 1], [], []>} : vector<16x64xbf16>, vector<64x32xbf16>, vector<16x32xf32> -> vector<16x32xf32>
    %c0_3 = arith.constant 0 : index
    %c0_4 = arith.constant 0 : index
    %4 = vector.load %arg3[%c0_3, %c0_4] : memref<1x32xf32, #tpu.memory_space<vmem>>, vector<1x32xf32>
    %5 = vector.broadcast %4 : vector<1x32xf32> to vector<16x32xf32>
    %6 = arith.addf %3, %5 : vector<16x32xf32>
    %cst_5 = arith.constant 0.000000e+00 : f32
    %7 = vector.broadcast %cst_5 : f32 to vector<16x32xf32>
    %8 = arith.maximumf %6, %7 : vector<16x32xf32>
    %cst_6 = arith.constant dense<0.000000e+00> : vector<16xf32>
    %9 = vector.multi_reduction <add>, %8, %cst_6 [1] : vector<16x32xf32> to vector<16xf32>
    %10 = vector.shape_cast %9 : vector<16xf32> to vector<16x1xf32>
    %cst_7 = arith.constant 3.200000e+01 : f32
    %11 = vector.broadcast %cst_7 : f32 to vector<16x1xf32>
    %12 = arith.divf %10, %11 : vector<16x1xf32>
    %13 = vector.broadcast %12 : vector<16x1xf32> to vector<16x32xf32>
    %14 = arith.subf %8, %13 : vector<16x32xf32>
    %15 = arith.mulf %14, %14 : vector<16x32xf32>
    %cst_8 = arith.constant dense<0.000000e+00> : vector<16xf32>
    %16 = vector.multi_reduction <add>, %15, %cst_8 [1] : vector<16x32xf32> to vector<16xf32>
    %17 = vector.shape_cast %16 : vector<16xf32> to vector<16x1xf32>
    %cst_9 = arith.constant 3.200000e+01 : f32
    %18 = vector.broadcast %cst_9 : f32 to vector<16x1xf32>
    %19 = arith.divf %17, %18 : vector<16x1xf32>
    %cst_10 = arith.constant 9.99999996E-13 : f32
    %20 = vector.broadcast %cst_10 : f32 to vector<16x1xf32>
    %21 = arith.addf %19, %20 : vector<16x1xf32>
    %22 = math.rsqrt %21 : vector<16x1xf32>
    %23 = vector.broadcast %22 : vector<16x1xf32> to vector<16x32xf32>
    %24 = arith.mulf %14, %23 : vector<16x32xf32>
    %c0_11 = arith.constant 0 : index
    %c0_12 = arith.constant 0 : index
    %25 = vector.load %arg4[%c0_11, %c0_12] : memref<1x32xf32, #tpu.memory_space<vmem>>, vector<1x32xf32>
    %26 = vector.broadcast %25 : vector<1x32xf32> to vector<16x32xf32>
    %27 = arith.mulf %24, %26 : vector<16x32xf32>
    %c0_13 = arith.constant 0 : index
    %c0_14 = arith.constant 0 : index
    %28 = vector.load %arg5[%c0_13, %c0_14] : memref<1x32xf32, #tpu.memory_space<vmem>>, vector<1x32xf32>
    %29 = vector.broadcast %28 : vector<1x32xf32> to vector<16x32xf32>
    %30 = arith.addf %27, %29 : vector<16x32xf32>
    %31 = arith.truncf %30 : vector<16x32xf32> to vector<16x32xbf16>
    %c0_15 = arith.constant 0 : index
    %c0_16 = arith.constant 0 : index
    %32 = vector.load %arg6[%c0_15, %c0_16] : memref<32x8xbf16, #tpu.memory_space<vmem>>, vector<32x8xbf16>
    %cst_17 = arith.constant dense<0.000000e+00> : vector<16x8xf32>
    %33 = tpu.matmul %31, %32, %cst_17 {dimension_numbers = #tpu.dot_dimension_numbers<[1], [0], [0], [1], [0, 0, 1, 1], [], []>} : vector<16x32xbf16>, vector<32x8xbf16>, vector<16x8xf32> -> vector<16x8xf32>
    %c0_18 = arith.constant 0 : index
    %c0_19 = arith.constant 0 : index
    %34 = vector.load %arg7[%c0_18, %c0_19] : memref<1x8xf32, #tpu.memory_space<vmem>>, vector<1x8xf32>
    %35 = vector.broadcast %34 : vector<1x8xf32> to vector<16x8xf32>
    %36 = arith.addf %33, %35 : vector<16x8xf32>
    %c0_20 = arith.constant 0 : index
    %c0_21 = arith.constant 0 : index
    %37 = vector.load %arg8[%c0_20, %c0_21] : memref<16x8xf32, #tpu.memory_space<vmem>>, vector<16x8xf32>
    tpu.vector_store %arg8[%c0_20, %c0_21], %36 {strides = array<i32>} : memref<16x8xf32, #tpu.memory_space<vmem>>, vector<16x8xf32>,
    return
  }
  func.func @transform_0(%arg0: i32) -> (i32, i32) {
    %c0_i32 = arith.constant 0 : i32
    %c0_i32_0 = arith.constant 0 : i32
    return %arg0, %c0_i32 : i32, i32
  }
  func.func @transform_1(%arg0: i32) -> (i32, i32) {
    %c0_i32 = arith.constant 0 : i32
    %c0_i32_0 = arith.constant 0 : i32
    %c0_i32_1 = arith.constant 0 : i32
    return %c0_i32, %c0_i32_0 : i32, i32
  }
  func.func @transform_2(%arg0: i32) -> (i32, i32) {
    %c0_i32 = arith.constant 0 : i32
    %c0_i32_0 = arith.constant 0 : i32
    %c0_i32_1 = arith.constant 0 : i32
    return %c0_i32, %c0_i32_0 : i32, i32
  }
  func.func @transform_3(%arg0: i32) -> (i32, i32) {
    %c0_i32 = arith.constant 0 : i32
    %c0_i32_0 = arith.constant 0 : i32
    %c0_i32_1 = arith.constant 0 : i32
    return %c0_i32, %c0_i32_0 : i32, i32
  }
  func.func @transform_4(%arg0: i32) -> (i32, i32) {
    %c0_i32 = arith.constant 0 : i32
    %c0_i32_0 = arith.constant 0 : i32
    %c0_i32_1 = arith.constant 0 : i32
    return %c0_i32, %c0_i32_0 : i32, i32
  }
  func.func @transform_5(%arg0: i32) -> (i32, i32) {
    %c0_i32 = arith.constant 0 : i32
    %c0_i32_0 = arith.constant 0 : i32
    %c0_i32_1 = arith.constant 0 : i32
    return %c0_i32, %c0_i32_0 : i32, i32
  }
  func.func @transform_6(%arg0: i32) -> (i32, i32) {
    %c0_i32 = arith.constant 0 : i32
    %c0_i32_0 = arith.constant 0 : i32
    %c0_i32_1 = arith.constant 0 : i32
    return %c0_i32, %c0_i32_0 : i32, i32
  }
  func.func @transform_7(%arg0: i32) -> (i32, i32) {
    %c0_i32 = arith.constant 0 : i32
    %c0_i32_0 = arith.constant 0 : i32
    return %arg0, %c0_i32 : i32, i32
  }
}

</mosaic_0001>

<bundles_post_ra>
// kernel: spatial_rel_regression.1
= control target key start
LH: loop header
LB: loop body
LE: loop exit
PB: predicated region body
PF: predicated region fallthrough
CT: control target
= control target key end

     0   :  { %v289_v0 = vmov 0.0   ;;  %vm290_vm0 = vmmov 0   ;;  %vm69_vm1 = vcmask 523264   ;;  %vm116_vm2 = vcmask 261120   ;;  %s378_s1 = inlined_call_operand.vmem [shape: bf16[64,32], index: 1, kind: input, shape index: {}]   ;;  %s379_s0 = inlined_call_operand.vmem [shape: f32[16,64], index: 0, kind: input, shape index: {}]   ;;  %s380_s2 = inlined_call_operand.vmem [shape: f32[1,32], index: 2, kind: input, shape index: {}]   ;;  %s381_s5 = inlined_call_operand.vmem [shape: bf16[32,8], index: 5, kind: input, shape index: {}]   ;;  %s382_s3 = inlined_call_operand.vmem [shape: f32[1,32], index: 3, kind: input, shape index: {}]   ;;  %s383_s4 = inlined_call_operand.vmem [shape: f32[1,32], index: 4, kind: input, shape index: {}]   ;;  %s384_s6 = inlined_call_operand.vmem [shape: f32[1,8], index: 6, kind: input, shape index: {}]   ;;  %s385_s7 = inlined_call_operand.vmem [shape: f32[16,8], index: 7, kind: output, shape index: {}]  }
   0x1   :  { %257 = vmatprep.subr.bf16.mxu0 %v289_v0  ;;  %v279_v1 = vld [vmem:[%s378_s1] sm:$0xff]   ;;  %265 = vmatprep.mubr.msk.bf16.mxu0 %vm290_vm0, %v289_v0  ;;  %v280_v2 = vld [vmem:[%s378_s1 + $0x8] sm:$0xff]   ;;  %v281_v3 = vld [vmem:[%s378_s1 + $0x10] sm:$0xff]   ;;  %vm230_vm3 = vcmask 64512  }
   0x2   :  { %269 = vmatprep.subr.bf16.mxu1 %v289_v0  ;;  %273 = vmatprep.mubr.msk.bf16.mxu1 %vm290_vm0, %v289_v0  ;;  %v282_v4 = vld [vmem:[%s378_s1 + $0x18] sm:$0xff]   ;;  %v27_v5 = vld [vmem:[%s379_s0] sm:$0xff]  ;;  %v28_v6 = vld [vmem:[%s379_s0 + $0x8] sm:$0xff] }
   0x3   :  { %258 = vmatpush3.bf16.msra.mxu0 %v279_v1  ;;  %v29_v7 = vpack.c.bf16 %v28_v6, %v27_v5  ;;  %v237_v8 = vld [vmem:[%s380_s2] ss:$0 sm:$0xff]  ;;  %v284_v30 = vld [vmem:[%s381_s5 + $0x8] sm:$0xff]  }
   0x4   :  { %259 = vmatprep.subr.bf16.mxu0 %v289_v0  ;;  %v283_v29 = vld [vmem:[%s381_s5] sm:$0xff]  }
   0x5   :  { %270 = vmatpush3.bf16.msra.mxu1 %v283_v29  ;;  %v243_v39 = vld [vmem:[%s382_s3] ss:$0 sm:$0xff] }
   0x6   :  { %271 = vmatprep.subr.bf16.mxu1 %v289_v0  ;;  %v244_v43 = vld [vmem:[%s383_s4] ss:$0 sm:$0xff] }
   0x7   :  { %260 = vmatpush3.bf16.msra.mxu0 %v280_v2  ;;  %v245_v48 = vld [vmem:[%s384_s6] ss:$0 sm:$0xff] }
   0x8   :  { %261 = vmatprep.subr.bf16.mxu0 %v289_v0 }
   0x9   :  { %272 = vmatpush3.bf16.msra.mxu1 %v284_v30 }
   0xb   :  { %262 = vmatpush3.bf16.msra.mxu0 %v281_v3 }
   0xc   :  { %263 = vmatprep.subr.bf16.mxu0 %v289_v0 }
   0xf   :  { %264 = vmatpush3.bf16.msra.mxu0 %v282_v4 }
  0x12   :  { %266 = vmatmul.mubr.msk.bf16.vlgmr.msra.gmra.mrb[0].mxu0 %vm69_vm1, %v29_v7 }
  0xe5   :  { %v107_v9 = vpop.f32.mrb[0].mxu0 }
  0xe6   :  { %v108_v10 = vadd.f32 %v237_v8, %v107_v9  ;;  %v267_v11 = vpop.f32.mrb[1].mxu0 }
  0xe7   :  { %v110_v12 = vpop.f32.mrb[2].mxu0 }
  0xe8   :  { %v114_v13 = vmax.f32 %v108_v10, 0.0  ;;  %v111_v14 = vadd.f32 %v237_v8, %v110_v12  ;;  %v268_v15 = vpop.f32.mrb[3].mxu0 }
  0xea   :  { %v115_v16 = vmax.f32 %v111_v14, 0.0  ;;  %v117_v17 = vsel %vm116_vm2, %v114_v13, 0.0 }
  0xeb   :  { %118 = vadd.xlane.f32.xlu0 %v117_v17 }
  0xec   :  { %v120_v18 = vsel %vm116_vm2, %v115_v16, 0.0 }
  0xef   :  { %121 = vadd.xlane.f32.xlu0 %v120_v18 }
 0x178   :  { %v119_v19 = vpop.xlane.xlu0 %118 }
 0x179   :  { %v124_v20 = vmul.f32 0.03125, %v119_v19 }
 0x17b   :  { %v126_v21 = vsub.f32 %v114_v13, %v124_v20 }
 0x17c   :  { %v122_v22 = vpop.xlane.xlu0 %121 }
 0x17d   :  { %v125_v23 = vmul.f32 0.03125, %v122_v22  ;;  %v128_v24 = vmul.f32 %v126_v21, %v126_v21 }
 0x17f   :  { %v127_v25 = vsub.f32 %v115_v16, %v125_v23  ;;  %v130_v26 = vsel %vm116_vm2, %v128_v24, 0.0 }
 0x180   :  { %131 = vadd.xlane.f32.xlu1 %v130_v26 }
 0x181   :  { %v129_v27 = vmul.f32 %v127_v25, %v127_v25 }
 0x183   :  { %v133_v28 = vsel %vm116_vm2, %v129_v27, 0.0 }
 0x184   :  { %134 = vadd.xlane.f32.xlu1 %v133_v28 }
 0x20d   :  { %v132_v31 = vpop.xlane.xlu1 %131 }
 0x20e   :  { %v136_v32 = vmul.f32 0.03125, %v132_v31 }
 0x210   :  { %v138_v33 = vadd.f32 1e-12, %v136_v32 }
 0x211   :  { %v135_v34 = vpop.xlane.xlu1 %134 }
 0x212   :  { %285 = vrsqrt.f32 %v138_v33  ;;  %v137_v35 = vmul.f32 0.03125, %v135_v34 }
 0x214   :  { %v139_v36 = vadd.f32 1e-12, %v137_v35 }
 0x216   :  { %287 = vrsqrt.f32 %v139_v36 }
 0x21c   :  { %v286_v37 = vpop.eup %285 }
 0x21d   :  { %v142_v38 = vmul.f32 %v286_v37, %v126_v21 }
 0x21f   :  { %v151_v42 = vmul.f32 %v243_v39, %v142_v38 }
 0x220   :  { %v288_v40 = vpop.eup %287 }
 0x221   :  { %v143_v41 = vmul.f32 %v288_v40, %v127_v25  ;;  %v160_v45 = vadd.f32 %v244_v43, %v151_v42 }
 0x223   :  { %v152_v44 = vmul.f32 %v243_v39, %v143_v41 }
 0x225   :  { %v161_v46 = vadd.f32 %v244_v43, %v152_v44 }
 0x227   :  { %v162_v47 = vpack.c.bf16 %v161_v46, %v160_v45 }
 0x229   :  { %274 = vmatmul.mubr.msk.bf16.vlgmr.msra.gmra.mrb[0].mxu1 %vm116_vm2, %v162_v47 }
 0x2fc   :  { %v223_v49 = vpop.f32.mrb[0].mxu1 }
 0x2fd   :  { %v224_v50 = vadd.f32 %v245_v48, %v223_v49  ;;  %v275_v51 = vpop.f32.mrb[1].mxu1 }
 0x2fe   :  { %v226_v52 = vpop.f32.mrb[2].mxu1 }
 0x2ff   :  { %231 = vst.msk [vmem:[%s385_s7] sm:$0xff] %vm230_vm3, %v224_v50  ;;  %v227_v53 = vadd.f32 %v245_v48, %v226_v52  ;;  %v276_v54 = vpop.f32.mrb[3].mxu1 }
 0x301   :  { %232 = vst.msk [vmem:[%s385_s7 + $0x8] sm:$0xff] %vm230_vm3, %v227_v53 }

</bundles_post_ra>
